<compile_context>
chip_gen: v5e
topology: v5e:2x2
jax: 0.10.0
libtpu: 0.0.40
codegen_flags: <defaults>
</compile_context>

<pallas_src>
import jax
import jax.numpy as jnp
from jax.experimental import pallas as pl
from jax.experimental.pallas import tpu as pltpu


def _adapter_kernel(x_ref, w1_ref, w2_ref, o_ref):
    # First linear (no bias): packed x @ block-diag(W1^T), f32 MXU accumulation.
    h = jnp.dot(x_ref[...], w1_ref[...], preferred_element_type=jnp.float32)
    h = jnp.maximum(h, 0.0)                       # ReLU in f32

    # Second linear (no bias): h @ block-diag(W2^T), f32 accumulation.
    y = jnp.dot(h.astype(w2_ref.dtype), w2_ref[...],
                preferred_element_type=jnp.float32)
    y = jnp.maximum(y, 0.0)                       # ReLU in f32

    o_ref[...] = y.astype(o_ref.dtype)


def adapter_forward(x, w1, w2, *, block_b=8192):
    """Adapter forward.

    x : [B, C_in]
    w1: [C_hid, C_in]   (PyTorch nn.Linear weight layout)
    w2: [C_in, C_hid]
    block_b: max packed rows per batch tile (sweep upward if xprof shows
             exposed DMA; keep double-buffered blocks under the VMEM limit).
    """
    B, C_in = x.shape
    C_hid, C_in_w = w1.shape
    assert C_in_w == C_in and w2.shape == (C_in, C_hid)

    dtype = x.dtype
    itemsize = jnp.dtype(dtype).itemsize
    sublane = {4: 8, 2: 16, 1: 32}.get(itemsize, 8)   # dtype-aware sublane packing

    # Lane-packing factor P: pack P samples per row so the lane dim is 128-wide.
    if C_in % 128 == 0:
        P = 1
    elif 128 % C_in == 0:
        P = 128 // C_in
    else:
        P = 1   # fallback: lane-padded path (still correct)

    # Pad batch to a multiple of P; zero rows produce zero outputs and are
    # sliced off below.
    B_pad = ((B + P - 1) // P) * P
    if B_pad != B:
        x = jnp.pad(x, ((0, B_pad - B), (0, 0)))
    rows = B_pad // P
    lane = P * C_in
    hid = P * C_hid

    # Free, contiguous row-major reshape: [B_pad, C_in] -> [rows, P*C_in].
    x_p = x.reshape(rows, lane)

    # Block-diagonal transposed weights (built once per call, tiny).
    eye_p = jnp.eye(P, dtype=dtype)
    w1_bd = jnp.kron(eye_p, w1.T.astype(dtype))   # [P*C_in, P*C_hid]
    w2_bd = jnp.kron(eye_p, w2.T.astype(dtype))   # [P*C_hid, P*C_in]

    # Tile selection: sublane-aligned, and >=2 grid tiles whenever possible so
    # both v7x TensorCores get work under dimension_semantics=("parallel",).
    if rows <= sublane:
        tb = rows                               # single full-extent tile
    else:
        tb = min(block_b, pl.cdiv(rows, 2))     # at least 2 tiles, capped by block_b
        tb = max(sublane, (tb // sublane) * sublane)
    grid = (pl.cdiv(rows, tb),)

    cost = pl.CostEstimate(
        flops=4 * B_pad * C_in * C_hid,                        # two matmuls (logical)
        transcendentals=0,
        bytes_accessed=(2 * B_pad * C_in + w1_bd.size + w2_bd.size) * itemsize,
    )

    out_p = pl.pallas_call(
        _adapter_kernel,
        out_shape=jax.ShapeDtypeStruct((rows, lane), dtype),
        grid_spec=pltpu.PrefetchScalarGridSpec(
            num_scalar_prefetch=0,
            grid=grid,
            in_specs=[
                pl.BlockSpec((tb, lane), lambda i: (i, 0)),     # packed x: tiled over rows
                pl.BlockSpec((lane, hid), lambda i: (0, 0)),    # W1_bd: VMEM-resident
                pl.BlockSpec((hid, lane), lambda i: (0, 0)),    # W2_bd: VMEM-resident
            ],
            out_specs=pl.BlockSpec((tb, lane), lambda i: (i, 0)),
        ),
        compiler_params=pltpu.CompilerParams(
            dimension_semantics=("parallel",),          # v7x: shard tiles over 2 TCs
            vmem_limit_bytes=48 * 1024 * 1024,          # safe on v5e/v6e/v7x
        ),
        cost_estimate=cost,
    )(x_p, w1_bd, w2_bd)

    out = out_p.reshape(B_pad, C_in)
    if B_pad != B:
        out = out[:B]
    return out


if __name__ == "__main__":
    key = jax.random.PRNGKey(0)
    k_x, k_w1, k_w2 = jax.random.split(key, 3)

    # Small shapes consistent with Adapter(c_in=32, reduction=4).
    # B=40 -> P=4 packing -> 10 packed rows -> 2 grid tiles (8 + ragged 2):
    # exercises lane-packing, multi-tile pipelining AND the masked last tile.
    B, C_in, reduction = 40, 32, 4
    C_hid = C_in // reduction

    x = jax.random.normal(k_x, (B, C_in), dtype=jnp.float32)
    # Weights in nn.Linear layout: [out_features, in_features]
    w1 = jax.random.normal(k_w1, (C_hid, C_in), dtype=jnp.float32) * 0.1
    w2 = jax.random.normal(k_w2, (C_in, C_hid), dtype=jnp.float32) * 0.1

    out = adapter_forward(x, w1, w2)
    out = jax.block_until_ready(out)

    # Reference check in plain JAX (same math as the PyTorch module).
    ref = jnp.maximum(jnp.maximum(x @ w1.T, 0.0) @ w2.T, 0.0)
    assert out.shape == (B, C_in)
    assert jnp.allclose(out, ref, atol=1e-5, rtol=1e-5)

    print("KERNEL_OK")
</pallas_src>

<mosaic_0001>
module attributes {stable_mosaic.version = 11 : i64} {
  func.func @_adapter_kernel(%arg0: i32, %arg1: memref<8x128xf32, #tpu.memory_space<vmem>>, %arg2: memref<128x32xf32, #tpu.memory_space<vmem>>, %arg3: memref<32x128xf32, #tpu.memory_space<vmem>>, %arg4: memref<8x128xf32, #tpu.memory_space<vmem>>) attributes {dimension_semantics = [#tpu.dimension_semantics<parallel>], iteration_bounds = array<i64: 2>, scalar_prefetch = 0 : i64, scratch_operands = 0 : i64, tpu.core_type = #tpu.core_type<tc>, window_params = [{transform_indices = @transform_0, window_bounds = array<i64: 8, 128>}, {pipeline_mode = #tpu.pipeline_mode<synchronous>, transform_indices = @transform_1, window_bounds = array<i64: 128, 32>}, {pipeline_mode = #tpu.pipeline_mode<synchronous>, transform_indices = @transform_2, window_bounds = array<i64: 32, 128>}, {transform_indices = @transform_3, window_bounds = array<i64: 8, 128>}]} {
    %c0 = arith.constant 0 : index
    %c0_0 = arith.constant 0 : index
    %0 = vector.load %arg1[%c0, %c0_0] : memref<8x128xf32, #tpu.memory_space<vmem>>, vector<8x128xf32>
    %c0_1 = arith.constant 0 : index
    %c0_2 = arith.constant 0 : index
    %1 = vector.load %arg2[%c0_1, %c0_2] : memref<128x32xf32, #tpu.memory_space<vmem>>, vector<128x32xf32>
    %cst = arith.constant dense<0.000000e+00> : vector<8x32xf32>
    %2 = tpu.matmul %0, %1, %cst {dimension_numbers = #tpu.dot_dimension_numbers<[1], [0], [0], [1], [0, 0, 1, 1], [], []>} : vector<8x128xf32>, vector<128x32xf32>, vector<8x32xf32> -> vector<8x32xf32>
    %cst_3 = arith.constant 0.000000e+00 : f32
    %3 = vector.broadcast %cst_3 : f32 to vector<8x32xf32>
    %4 = arith.maximumf %2, %3 : vector<8x32xf32>
    %c0_4 = arith.constant 0 : index
    %c0_5 = arith.constant 0 : index
    %5 = vector.load %arg3[%c0_4, %c0_5] : memref<32x128xf32, #tpu.memory_space<vmem>>, vector<32x128xf32>
    %cst_6 = arith.constant dense<0.000000e+00> : vector<8x128xf32>
    %6 = tpu.matmul %4, %5, %cst_6 {dimension_numbers = #tpu.dot_dimension_numbers<[1], [0], [0], [1], [0, 0, 1, 1], [], []>} : vector<8x32xf32>, vector<32x128xf32>, vector<8x128xf32> -> vector<8x128xf32>
    %cst_7 = arith.constant 0.000000e+00 : f32
    %7 = vector.broadcast %cst_7 : f32 to vector<8x128xf32>
    %8 = arith.maximumf %6, %7 : vector<8x128xf32>
    %c0_8 = arith.constant 0 : index
    %c0_9 = arith.constant 0 : index
    %9 = vector.load %arg4[%c0_8, %c0_9] : memref<8x128xf32, #tpu.memory_space<vmem>>, vector<8x128xf32>
    tpu.vector_store %arg4[%c0_8, %c0_9], %8 {strides = array<i32>} : memref<8x128xf32, #tpu.memory_space<vmem>>, vector<8x128xf32>,
    return
  }
  func.func @transform_0(%arg0: i32) -> (i32, i32) {
    %c0_i32 = arith.constant 0 : i32
    %c0_i32_0 = arith.constant 0 : i32
    return %arg0, %c0_i32 : i32, i32
  }
  func.func @transform_1(%arg0: i32) -> (i32, i32) {
    %c0_i32 = arith.constant 0 : i32
    %c0_i32_0 = arith.constant 0 : i32
    %c0_i32_1 = arith.constant 0 : i32
    return %c0_i32, %c0_i32_0 : i32, i32
  }
  func.func @transform_2(%arg0: i32) -> (i32, i32) {
    %c0_i32 = arith.constant 0 : i32
    %c0_i32_0 = arith.constant 0 : i32
    %c0_i32_1 = arith.constant 0 : i32
    return %c0_i32, %c0_i32_0 : i32, i32
  }
  func.func @transform_3(%arg0: i32) -> (i32, i32) {
    %c0_i32 = arith.constant 0 : i32
    %c0_i32_0 = arith.constant 0 : i32
    return %arg0, %c0_i32 : i32, i32
  }
}

</mosaic_0001>

<bundles_post_ra>
// kernel: tpu_custom_call.1
= control target key start
LH: loop header
LB: loop body
LE: loop exit
PB: predicated region body
PF: predicated region fallthrough
CT: control target
= control target key end

     0   :  { %8 = vsyncpa [#allocation3], 0  ;;  %s588_s0 = inlined_call_operand.vmem [shape: f32[10,128], index: 0, kind: input, shape index: {}]   ;;  %s589_s1 = inlined_call_operand.vmem [shape: f32[128,32], index: 1, kind: input, shape index: {}]   ;;  %s590_s2 = inlined_call_operand.vmem [shape: f32[32,128], index: 2, kind: input, shape index: {}]   ;;  %s591_s3 = inlined_call_operand.hbm [shape: f32[10,128], index: 3, kind: output, shape index: {}]  }
   0x1   :  { %10 = vsyncpa [#allocation3 + $0x1], 0  ;;  %s443_s12 = smov 0   ;;  %s445_s13 = smov 0  }
   0x2   :  { %s447_s14 = smov 0   ;;  %s449_s15 = smov 0  }
   0x3 LB: > { %s464_s16 = sadd.s32 4294967295, %s421_s15   ;;  %s309_s17 = sadd.s32 4294967294, %s421_s15   ;;  %s421_s15 = sphi %s449_s15, %s597_s15   ;;  %s417_s14 = sphi %s447_s14, %s596_s14   ;;  %s413_s13 = sphi %s445_s13, %s595_s13   ;;  %s409_s12 = sphi %s443_s12, %s594_s12  }
   0x4   : > { %s468_s18 = sadd.s32 1, %s421_s15   ;;  %s91_s19 = sadd.s32 1, %s417_s14 }
   0x5   : > { %s88_s20 = ssub.s32 %s421_s15, %s468_s18  ;;  %p101_p0 = scmp.ne.s32.totalorder %s417_s14, %s413_s13 }
   0x6   : > { %p89_p1 = scmp.eq.s32.totalorder %s88_s20, 0  ;;  %p102_p2 = scmp.eq.s32.totalorder %s464_s16, 1 }
   0x7   : > { %p107_p3 = scmp.ne.s32.totalorder %s413_s13, %s409_s12  ;;  %p108_p4 = scmp.eq.s32.totalorder %s309_s17, 1 }
   0x8   : > { %s479_s21 = scalar_select %p89_p1, %s417_s14, %s91_s19  }
   0x9   : > { %p481_p5 = por %p102_p2, %p101_p0  ;;  %p485_p6 = por %p108_p4, %p107_p3 }
   0xa   : > { %p312_p7 = scmp.ge.s32.totalorder %s421_s15, 1  ;;  %p139_p8 = scmp.lt.s32.totalorder %s421_s15, 3 }
   0xc   : > { %p140_p9 = pnand %p312_p7, %p139_p8 }
   0xd   : > { %p162_p10 = scmp.lt.s32.totalorder (!%p140_p9), %s464_s16, 1  ;;  %s159_s6 = sand.u32 (!%p140_p9), 1, %s413_s13  }
   0xe   : > { %143 = sbr.rel (%p140_p9) target bundleno = 310 (0x136), region = 32  ;;  %s313_s7 = sshll.u32 (!%p140_p9), %s159_s6, 3 }
   0xf   : > { %s317_s8 = sshll.u32 (!%p140_p9), %s464_s16, 3  ;;  %s161_s17 = scalar_lea.vmem (!%p140_p9), [#allocation2], %s313_s7 }
  0x10   : > { %s245_s11 = scalar_lea.hbm (!%p140_p9), %s591_s3, %s317_s8  ;;  %s247_s19 = sshll.u32 (!%p140_p9), %s161_s17, 4  ;;  %s248_s19 = int_to_ptr.vmem [resolvable:$true] %s247_s19 }
  0x11   : > { %s249_s20 = sshll.u32 (!%p140_p9), %s245_s11, 4  ;;  %s235_s24 = scalar_lea.sflag (!%p140_p9), [#allocation3], %s159_s6  ;;  %s250_s20 = int_to_ptr.hbm [resolvable:$true] %s249_s20 }
  0x12   : > { %s373_s25 = sshra.s32 (!%p140_p9), %s250_s20, 4  ;;  %s379_s28 = scalar_lea.hbm (!%p140_p9), %s591_s3, 16  ;;  %s374_s25 = int_to_ptr.hbm [resolvable:$true] %s373_s25 }
  0x13   : > { %v182_v0 = vld [vmem:[%s589_s1 + $0x78] sm:$0xff]  ;;  %v181_v1 = vld [vmem:[%s589_s1 + $0x70] sm:$0xff]  ;;  %v180_v2 = vld [vmem:[%s589_s1 + $0x68] sm:$0xff]  ;;  %s163_s5 = scalar_select %p162_p10, %s464_s16, 1  ;;  %vm208_vm0 = vcmask 261120  }
  0x14   : > { %183 = vmatpush.msra.mxu0 %v182_v0  ;;  %v179_v3 = vld [vmem:[%s589_s1 + $0x60] sm:$0xff]  ;;  %v207_v4 = vld [vmem:[%s590_s2 + $0x18] sm:$0xff]  ;;  %v206_v5 = vld [vmem:[%s590_s2 + $0x10] sm:$0xff]  ;;  %p380_p0 = scmp.lt.s32.totalorder %s374_s25, %s591_s3 }
  0x15   : > { %v178_v6 = vld [vmem:[%s589_s1 + $0x58] sm:$0xff]  ;;  %224 = vmatpush.msra.mxu1 %v207_v4  ;;  %v177_v7 = vld [vmem:[%s589_s1 + $0x50] sm:$0xff]  ;;  %v176_v8 = vld [vmem:[%s589_s1 + $0x48] sm:$0xff]  ;;  %s314_s10 = sshll.u32 %s163_s5, 3 }
  0x16   : > { %184 = vmatpush.msra.mxu0 %v181_v1  ;;  %v175_v9 = vld [vmem:[%s589_s1 + $0x40] sm:$0xff]  ;;  %v174_v10 = vld [vmem:[%s589_s1 + $0x38] sm:$0xff]  ;;  %v173_v11 = vld [vmem:[%s589_s1 + $0x30] sm:$0xff]  ;;  %s165_s26 = scalar_lea.vmem %s588_s0, %s314_s10 }
  0x17   : > { %225 = vmatpush.msra.mxu1 %v206_v5  ;;  %v172_v12 = vld [vmem:[%s589_s1 + $0x28] sm:$0xff]  ;;  %v171_v13 = vld [vmem:[%s589_s1 + $0x20] sm:$0xff]  ;;  %v170_v14 = vld [vmem:[%s589_s1 + $0x18] sm:$0xff] }
  0x18   : > { %185 = vmatpush.msra.mxu0 %v180_v2  ;;  %v169_v15 = vld [vmem:[%s589_s1 + $0x10] sm:$0xff]  ;;  %v168_v16 = vld [vmem:[%s589_s1 + $0x8] sm:$0xff]  ;;  %v167_v17 = vld [vmem:[%s589_s1] sm:$0xff] }
  0x19   : > { %v166_v18 = vld [vmem:[%s165_s26] sm:$0xff]  ;;  %v205_v19 = vld [vmem:[%s590_s2 + $0x8] sm:$0xff]  ;;  %s375_s26 = scalar_lea.hbm %s374_s25, 8 }
  0x1a   : > { %186 = vmatpush.msra.mxu0 %v179_v3  ;;  %226 = vmatpush.msra.mxu1 %v205_v19  ;;  %v204_v20 = vld [vmem:[%s590_s2] sm:$0xff]  ;;  %p376_p11 = scmp.ne.s32.totalorder %s374_s25, %s375_s26  ;;  %p381_p1 = scmp.lt.s32.totalorder %s379_s28, %s375_s26 }
  0x1c   : > { %187 = vmatpush.msra.mxu0 %v178_v6  ;;  %227 = vmatpush.msra.mxu1 %v204_v20  ;;  %p377_p12 = pnand %p376_p11, %p481_p5  ;;  %p382_p2 = por %p381_p1, %p380_p0 }
  0x1e   : > { %188 = vmatpush.msra.mxu0 %v177_v7  ;;  %p378_p13 = pneg %p377_p12 }
  0x20   : > { %189 = vmatpush.msra.mxu0 %v176_v8  ;;  %p383_p3 = pnand %p382_p2, %p378_p13 }
  0x22   : > { %190 = vmatpush.msra.mxu0 %v175_v9 }
  0x24   : > { %191 = vmatpush.msra.mxu0 %v174_v10 }
  0x26   : > { %192 = vmatpush.msra.mxu0 %v173_v11 }
  0x28   : > { %193 = vmatpush.msra.mxu0 %v172_v12 }
  0x2a   : > { %194 = vmatpush.msra.mxu0 %v171_v13 }
  0x2c   : > { %195 = vmatpush.msra.mxu0 %v170_v14 }
  0x2e   : > { %196 = vmatpush.msra.mxu0 %v169_v15 }
  0x30   : > { %197 = vmatpush.msra.mxu0 %v168_v16 }
  0x32   : > { %198 = vmatpush.msra.mxu0 %v167_v17 }
  0x33   : > { %199 = vmatmul.f32.vlgmr.msra.gmra.mxu0 %v166_v18 }
  0xb0   : > { %v200_v21 = vpop.f32.mrf.mxu0 }
  0xb1   : > { %v203_v22 = vmax.f32 %v200_v21, 0.0 }
  0xb3   : > { %315 = vmatmul.msk.f32.vlgmr.msra.gmra.mxu1 %vm208_vm0, %v203_v22 }
 0x130   : > { %v229_v23 = vpop.f32.mrf.mxu1 }
 0x131   : > { %v232_v24 = vmax.f32 %v229_v23, 0.0 }
 0x133   : > { %233 = vst [vmem:[%s161_s17] sm:$0xff] %v232_v24 }
 0x134   : > { %386 = shalt.err (!%p383_p3)
}
 0x135   : > { %320 = dma.vmem_to_hbm [thread:$0]  (%p481_p5), %s248_s19, 128, %s250_s20, %s235_s24  }
 0x136 PF: > { %p326_p4 = scmp.ge.s32.totalorder %s421_s15, 2  ;;  %s261_s4 = sand.u32 1, %s409_s12  }
 0x137   : > { %s262_s5 = scalar_lea.sflag [#allocation3], %s261_s4 }
 0x138   : > { %p323_p7 = pnand %p326_p4, %p485_p6 }
 0x13a   : > { %p324_p8 = pneg %p323_p7 }
 0x13c   : > { %404 = dma.done.wait (%p324_p8), %s262_s5, 128  }
 0x13d   : > { %406 = vsyncadd (%p324_p8), %s262_s5, 4294967168  ;;  %p13_p9 = scmp.ge.s32.totalorder %s468_s18, 4   ;;  %s594_s12 = smov %s413_s13 }
 0x13e   : > { %s595_s13 = smov %s417_s14  ;;  %s596_s14 = smov %s479_s21 }
 0x13f   : > { %s597_s15 = smov %s468_s18  ;;  %15 = sbr.rel (!%p13_p9) target bundleno = 3 (0x3), region = 67 }
 0x144   :  { %268 = vsyncpa [#allocation3], 1 }
 0x145   :  { %270 = vsyncpa [#allocation3 + $0x1], 1 }

</bundles_post_ra>
